<compile_context>
chip_gen: v7x
topology: tpu7x:2x2x1
jax: 0.10.0
libtpu: 0.0.40
codegen_flags: <defaults>
</compile_context>

<pallas_src>
import functools

import numpy as np

import jax
import jax.numpy as jnp
from jax.experimental import pallas as pl
from jax.experimental.pallas import tpu as pltpu


# ----------------------------------------------------------------------------
# Tiling policy
# ----------------------------------------------------------------------------
_TARGET_BLOCK_ELEMS = 512 * 512        # ~256K elems/block: measured HBM sweet spot
_SUB_FULL_MAX = 2048                   # max sublane rows before tiling that axis
_VMEM_LIMIT_BYTES = 32 * 1024 * 1024   # safe on v5e/v6e (128 MiB) and v7x (64 MiB)


def _round_up(x, m):
    return (x + m - 1) // m * m


def _pick_block(n, align, cap):
    """Largest multiple of `align` that divides `n` and is <= cap (n % align == 0)."""
    top = min(n, max(cap, align))
    top -= top % align
    for d in range(top, align - 1, -align):
        if n % d == 0:
            return d
    return align


def _lane_sizes(spatial, sub_rows):
    """Pick (lane_tile, padded_spatial) given the sublane footprint of one block."""
    budget = max(128, (_TARGET_BLOCK_ELEMS // max(sub_rows, 8)) // 128 * 128)
    s128 = _round_up(spatial, 128)
    if s128 <= budget:
        return s128, s128                      # whole (padded) spatial row per step
    s_pad = _round_up(spatial, 512)            # guarantees >=512-wide lane tiles
    return _pick_block(s_pad, 128, budget), s_pad


# ----------------------------------------------------------------------------
# Kernels
# ----------------------------------------------------------------------------
def _kl_scalar_kernel(p_ref, t_ref, w_ref, out_ref, acc_ref, *, eps):
    """Per-row-block partial sums of weighted KL.

    grid = (row_blocks [parallel], lane_tiles [arbitrary, reduction]).
    acc_ref is a full-block f32 accumulator: per step only VPU adds; the
    cross-lane reduce + weight multiply happen once per row block.
    """
    j = pl.program_id(1)

    @pl.when(j == 0)
    def _():
        acc_ref[...] = jnp.zeros_like(acc_ref)

    p = p_ref[...].astype(jnp.float32)
    t = t_ref[...].astype(jnp.float32)
    acc_ref[...] += -t * jnp.log((p + eps) / (t + eps))

    @pl.when(j == pl.num_programs(1) - 1)
    def _():
        # One XLU cross-lane reduce per row block, then fold in the per-row weight.
        out_ref[...] = jnp.sum(acc_ref[...], axis=1, keepdims=True) * w_ref[...]


def _kl_none_kernel(p_ref, t_ref, w_ref, out_ref, *, eps):
    """Weighted KL reduced over the channel axis only.

    Blocks are (b_blk, C, lane_tile); the channel sum is a direct axis-1
    reduce of the block (no reshape / relayout).
    """
    p = p_ref[...].astype(jnp.float32)          # (b_blk, C, T)
    t = t_ref[...].astype(jnp.float32)
    kl = -t * jnp.log((p + eps) / (t + eps))
    kl = kl * w_ref[...]                        # (1, C, 1) broadcast
    out_ref[...] = jnp.sum(kl, axis=1)          # (b_blk, T)


# ----------------------------------------------------------------------------
# Wrapper
# ----------------------------------------------------------------------------
def kl_div(prob, target, *, weight=None, reduction="mean", eps=1e-16):
    assert reduction in ("mean", "sum", "none")
    assert prob.shape == target.shape, (prob.shape, target.shape)
    b, c, *hwd = target.shape
    spatial = int(np.prod(hwd)) if hwd else 1

    # per-channel weight, normalized exactly as in the PyTorch module
    if weight is not None:
        w = jnp.asarray(weight, jnp.float32).reshape(c)
        w = w / w.sum() * c
    else:
        w = jnp.ones((c,), jnp.float32)

    if reduction in ("mean", "sum"):
        # layout: (B*C, S) -- native dtype, no wrapper upcast
        rows = b * c
        p2 = prob.reshape(rows, spatial)
        t2 = target.reshape(rows, spatial)

        if rows <= _SUB_FULL_MAX:
            rows_pad, row_block = rows, rows
        else:
            rows_pad = _round_up(rows, 8)
            row_block = _pick_block(rows_pad, 8, _SUB_FULL_MAX)
        lane_tile, s_pad = _lane_sizes(spatial, row_block)

        if (rows_pad, s_pad) != (rows, spatial):
            pad = ((0, rows_pad - rows), (0, s_pad - spatial))
            p2 = jnp.pad(p2, pad)      # zero target/prob contribute exactly 0
            t2 = jnp.pad(t2, pad)

        w_rows = jnp.tile(w, b).reshape(rows, 1)
        if rows_pad != rows:
            w_rows = jnp.pad(w_rows, ((0, rows_pad - rows), (0, 0)))

        grid = (rows_pad // row_block, s_pad // lane_tile)

        partial = pl.pallas_call(
            functools.partial(_kl_scalar_kernel, eps=eps),
            out_shape=jax.ShapeDtypeStruct((rows_pad, 1), jnp.float32),
            grid_spec=pltpu.PrefetchScalarGridSpec(
                num_scalar_prefetch=0,
                grid=grid,
                in_specs=[
                    pl.BlockSpec((row_block, lane_tile), lambda r, j: (r, j)),
                    pl.BlockSpec((row_block, lane_tile), lambda r, j: (r, j)),
                    pl.BlockSpec((row_block, 1), lambda r, j: (r, 0)),
                ],
                out_specs=pl.BlockSpec((row_block, 1), lambda r, j: (r, 0)),
                scratch_shapes=[pltpu.VMEM((row_block, lane_tile), jnp.float32)],
            ),
            compiler_params=pltpu.CompilerParams(
                dimension_semantics=("parallel", "arbitrary"),
                vmem_limit_bytes=_VMEM_LIMIT_BYTES,
            ),
        )(p2, t2, w_rows)

        total = jnp.sum(partial)
        if reduction == "mean":
            # kl.sum(1).mean() == total_weighted_sum / (B * H * W)
            return total / jnp.float32(b * spatial)
        return total

    # ---------------- reduction == 'none' ----------------
    # layout: (B, C, S) with blocks (b_blk, C, lane_tile); C stays whole so the
    # channel sum is a single in-block axis-1 reduce.
    p3 = prob.reshape(b, c, spatial)
    t3 = target.reshape(b, c, spatial)

    c_sub = _round_up(c, 8)                    # sublane-padded channel footprint
    if b * c_sub <= _SUB_FULL_MAX:
        b_pad, b_blk = b, b
    else:
        b_pad = _round_up(b, 8)
        b_blk = _pick_block(b_pad, 8, max(8, _SUB_FULL_MAX // c_sub))
    lane_tile, s_pad = _lane_sizes(spatial, b_blk * c_sub)

    if (b_pad, s_pad) != (b, spatial):
        pad = ((0, b_pad - b), (0, 0), (0, s_pad - spatial))
        p3 = jnp.pad(p3, pad)
        t3 = jnp.pad(t3, pad)

    w3 = w.reshape(1, c, 1)
    grid = (b_pad // b_blk, s_pad // lane_tile)

    out = pl.pallas_call(
        functools.partial(_kl_none_kernel, eps=eps),
        out_shape=jax.ShapeDtypeStruct((b_pad, s_pad), jnp.float32),
        grid_spec=pltpu.PrefetchScalarGridSpec(
            num_scalar_prefetch=0,
            grid=grid,
            in_specs=[
                pl.BlockSpec((b_blk, c, lane_tile), lambda i, j: (i, 0, j)),
                pl.BlockSpec((b_blk, c, lane_tile), lambda i, j: (i, 0, j)),
                pl.BlockSpec((1, c, 1), lambda i, j: (0, 0, 0)),
            ],
            out_specs=pl.BlockSpec((b_blk, lane_tile), lambda i, j: (i, j)),
        ),
        compiler_params=pltpu.CompilerParams(
            dimension_semantics=("parallel", "parallel"),
            vmem_limit_bytes=_VMEM_LIMIT_BYTES,
        ),
    )(p3, t3, w3)

    out = out[:b, :spatial]
    return out.reshape(b, *hwd)


# ----------------------------------------------------------------------------
# Pure-JAX reference (mirrors the PyTorch forward exactly, in f32)
# ----------------------------------------------------------------------------
def kl_div_ref(prob, target, *, weight=None, reduction="mean", eps=1e-16):
    b, c, *hwd = target.shape
    kl = -target * jnp.log((prob + eps) / (target + eps))
    if weight is not None:
        w = jnp.asarray(weight, jnp.float32)
        w = w / w.sum() * c
        kl = kl * w.reshape(1, c, *([1] * len(hwd)))
    kl = kl.sum(axis=1)
    if reduction == "mean":
        return kl.mean()
    if reduction == "sum":
        return kl.sum()
    return kl


if __name__ == "__main__":
    key = jax.random.PRNGKey(0)
    k1, k2, k3, k4 = jax.random.split(key, 4)

    # --- primary small shape (B, C, H, W) = (2, 4, 16, 16), f32, with weights ---
    B, C, H, W = 2, 4, 16, 16
    prob = jax.nn.softmax(jax.random.normal(k1, (B, C, H, W), jnp.float32), axis=1)
    target = jax.nn.softmax(jax.random.normal(k2, (B, C, H, W), jnp.float32), axis=1)
    weight = [1.0, 2.0, 3.0, 4.0]

    for red in ("mean", "sum", "none"):
        out = jax.block_until_ready(kl_div(prob, target, weight=weight, reduction=red))
        ref = kl_div_ref(prob, target, weight=weight, reduction=red)
        assert jnp.allclose(out, ref, rtol=1e-5, atol=1e-6), (red, out, ref)

    # --- odd, non-aligned shape exercises the zero-padding path ---
    p_odd = jax.nn.softmax(jax.random.normal(k3, (3, 5, 7, 9), jnp.float32), axis=1)
    t_odd = jax.nn.softmax(jax.random.normal(k4, (3, 5, 7, 9), jnp.float32), axis=1)
    for red in ("mean", "none"):
        out = jax.block_until_ready(kl_div(p_odd, t_odd, reduction=red))
        ref = kl_div_ref(p_odd, t_odd, reduction=red)
        assert jnp.allclose(out, ref, rtol=1e-5, atol=1e-6), red

    # --- larger spatial extent exercises the multi-tile lane grid ---
    p_big = jax.nn.softmax(jax.random.normal(k1, (2, 4, 256, 256), jnp.float32), axis=1)
    t_big = jax.nn.softmax(jax.random.normal(k2, (2, 4, 256, 256), jnp.float32), axis=1)
    out = jax.block_until_ready(kl_div(p_big, t_big, weight=weight, reduction="mean"))
    ref = kl_div_ref(p_big, t_big, weight=weight, reduction="mean")
    assert jnp.allclose(out, ref, rtol=1e-5, atol=1e-6), (out, ref)
    out_n = jax.block_until_ready(kl_div(p_big, t_big, weight=weight, reduction="none"))
    ref_n = kl_div_ref(p_big, t_big, weight=weight, reduction="none")
    assert jnp.allclose(out_n, ref_n, rtol=1e-4, atol=1e-6)

    # --- bf16 inputs: DMA'd in native dtype, cast to f32 inside the kernel ---
    prob_bf = prob.astype(jnp.bfloat16)
    target_bf = target.astype(jnp.bfloat16)
    out = jax.block_until_ready(kl_div(prob_bf, target_bf, reduction="mean"))
    ref = kl_div_ref(prob_bf.astype(jnp.float32), target_bf.astype(jnp.float32),
                     reduction="mean")
    assert jnp.allclose(out, ref, rtol=1e-5, atol=1e-6), (out, ref)

    print("KERNEL_OK")
</pallas_src>

<mosaic_0001>
module attributes {stable_mosaic.version = 11 : i64} {
  func.func @_kl_scalar_kernel(%arg0: i32, %arg1: i32, %arg2: memref<8x256xf32, #tpu.memory_space<vmem>>, %arg3: memref<8x256xf32, #tpu.memory_space<vmem>>, %arg4: memref<8x1xf32, #tpu.memory_space<vmem>>, %arg5: memref<8x1xf32, #tpu.memory_space<vmem>>, %arg6: memref<8x256xf32, #tpu.memory_space<vmem>>) attributes {dimension_semantics = [#tpu.dimension_semantics<parallel>, #tpu.dimension_semantics<arbitrary>], iteration_bounds = array<i64: 1, 1>, scalar_prefetch = 0 : i64, scratch_operands = 1 : i64, tpu.core_type = #tpu.core_type<tc>, window_params = [{transform_indices = @transform_0, window_bounds = array<i64: 8, 256>}, {transform_indices = @transform_1, window_bounds = array<i64: 8, 256>}, {transform_indices = @transform_2, window_bounds = array<i64: 8, 1>}, {transform_indices = @transform_3, window_bounds = array<i64: 8, 1>}]} {
    %c0_i32 = arith.constant 0 : i32
    %0 = arith.cmpi eq, %arg1, %c0_i32 : i32
    %1 = arith.extui %0 : i1 to i32
    %c0_i32_0 = arith.constant 0 : i32
    %2 = arith.cmpi ne, %1, %c0_i32_0 : i32
    scf.if %2 {
      %cst_12 = arith.constant 0.000000e+00 : f32
      %20 = vector.broadcast %cst_12 : f32 to vector<8x256xf32>
      %c0_13 = arith.constant 0 : index
      %c0_14 = arith.constant 0 : index
      %21 = vector.load %arg6[%c0_13, %c0_14] : memref<8x256xf32, #tpu.memory_space<vmem>>, vector<8x256xf32>
      tpu.vector_store %arg6[%c0_13, %c0_14], %20 {strides = array<i32>} : memref<8x256xf32, #tpu.memory_space<vmem>>, vector<8x256xf32>,
    } else {
    }
    %c0 = arith.constant 0 : index
    %c0_1 = arith.constant 0 : index
    %3 = vector.load %arg2[%c0, %c0_1] : memref<8x256xf32, #tpu.memory_space<vmem>>, vector<8x256xf32>
    %c0_2 = arith.constant 0 : index
    %c0_3 = arith.constant 0 : index
    %4 = vector.load %arg3[%c0_2, %c0_3] : memref<8x256xf32, #tpu.memory_space<vmem>>, vector<8x256xf32>
    %c0_4 = arith.constant 0 : index
    %c0_5 = arith.constant 0 : index
    %5 = vector.load %arg6[%c0_4, %c0_5] : memref<8x256xf32, #tpu.memory_space<vmem>>, vector<8x256xf32>
    %cst = arith.constant 0.000000e+00 : f32
    %6 = vector.broadcast %cst : f32 to vector<8x256xf32>
    %7 = arith.subf %6, %4 : vector<8x256xf32>
    %cst_6 = arith.constant 1.000000e-16 : f32
    %8 = vector.broadcast %cst_6 : f32 to vector<8x256xf32>
    %9 = arith.addf %3, %8 : vector<8x256xf32>
    %cst_7 = arith.constant 1.000000e-16 : f32
    %10 = vector.broadcast %cst_7 : f32 to vector<8x256xf32>
    %11 = arith.addf %4, %10 : vector<8x256xf32>
    %12 = arith.divf %9, %11 : vector<8x256xf32>
    %13 = math.log %12 : vector<8x256xf32>
    %14 = arith.mulf %7, %13 : vector<8x256xf32>
    %15 = arith.addf %5, %14 : vector<8x256xf32>
    %c0_8 = arith.constant 0 : index
    %c0_9 = arith.constant 0 : index
    %16 = vector.load %arg6[%c0_8, %c0_9] : memref<8x256xf32, #tpu.memory_space<vmem>>, vector<8x256xf32>
    tpu.vector_store %arg6[%c0_8, %c0_9], %15 {strides = array<i32>} : memref<8x256xf32, #tpu.memory_space<vmem>>, vector<8x256xf32>,
    %c0_i32_10 = arith.constant 0 : i32
    %17 = arith.cmpi eq, %arg1, %c0_i32_10 : i32
    %18 = arith.extui %17 : i1 to i32
    %c0_i32_11 = arith.constant 0 : i32
    %19 = arith.cmpi ne, %18, %c0_i32_11 : i32
    scf.if %19 {
      %c0_12 = arith.constant 0 : index
      %c0_13 = arith.constant 0 : index
      %20 = vector.load %arg6[%c0_12, %c0_13] : memref<8x256xf32, #tpu.memory_space<vmem>>, vector<8x256xf32>
      %cst_14 = arith.constant dense<0.000000e+00> : vector<8xf32>
      %21 = vector.multi_reduction <add>, %20, %cst_14 [1] : vector<8x256xf32> to vector<8xf32>
      %22 = vector.shape_cast %21 : vector<8xf32> to vector<8x1xf32>
      %c0_15 = arith.constant 0 : index
      %c0_16 = arith.constant 0 : index
      %23 = vector.load %arg4[%c0_15, %c0_16] : memref<8x1xf32, #tpu.memory_space<vmem>>, vector<8x1xf32>
      %24 = arith.mulf %22, %23 : vector<8x1xf32>
      %c0_17 = arith.constant 0 : index
      %c0_18 = arith.constant 0 : index
      %25 = vector.load %arg5[%c0_17, %c0_18] : memref<8x1xf32, #tpu.memory_space<vmem>>, vector<8x1xf32>
      tpu.vector_store %arg5[%c0_17, %c0_18], %24 {strides = array<i32>} : memref<8x1xf32, #tpu.memory_space<vmem>>, vector<8x1xf32>,
    } else {
    }
    return
  }
  func.func @transform_0(%arg0: i32, %arg1: i32) -> (i32, i32) {
    %c0_i32 = arith.constant 0 : i32
    return %arg0, %arg1 : i32, i32
  }
  func.func @transform_1(%arg0: i32, %arg1: i32) -> (i32, i32) {
    %c0_i32 = arith.constant 0 : i32
    return %arg0, %arg1 : i32, i32
  }
  func.func @transform_2(%arg0: i32, %arg1: i32) -> (i32, i32) {
    %c0_i32 = arith.constant 0 : i32
    %c0_i32_0 = arith.constant 0 : i32
    return %arg0, %c0_i32 : i32, i32
  }
  func.func @transform_3(%arg0: i32, %arg1: i32) -> (i32, i32) {
    %c0_i32 = arith.constant 0 : i32
    %c0_i32_0 = arith.constant 0 : i32
    return %arg0, %c0_i32 : i32, i32
  }
}

</mosaic_0001>

<bundles_post_ra>
// kernel: tpu_custom_call.1
= control target key start
LH: loop header
LB: loop body
LE: loop exit
PB: predicated region body
PF: predicated region fallthrough
CT: control target
= control target key end

     0   :  { %8 = vsyncpa [#allocation4], 0  ;;  %s198_s0 = inlined_call_operand.hbm [shape: f32[8,256], index: 0, kind: input, shape index: {}]   ;;  %s199_s1 = inlined_call_operand.hbm [shape: f32[8,256], index: 1, kind: input, shape index: {}]   ;;  %s200_s2 = inlined_call_operand.vmem [shape: f32[8,1], index: 2, kind: input, shape index: {}]   ;;  %s201_s3 = inlined_call_operand.vmem [shape: f32[8,1], index: 3, kind: output, shape index: {}]  }
   0x1   :  { %9 = vsyncpa [#allocation6], 0  ;;  %s146_s12 = smov [#allocation3]   ;;  %s147_s14 = smov [#allocation5]  }
   0x2   :  { %s16_s13 = sshll.u32 %s146_s12, 4  ;;  %s26_s15 = sshll.u32 %s147_s14, 4  ;;  %s17_s13 = int_to_ptr.vmem [resolvable:$true] %s16_s13  ;;  %s27_s15 = int_to_ptr.vmem [resolvable:$true] %s26_s15 }
   0x3   :  { %s98_s18 = scalar_lea.hbm %s198_s0, 256 }
   0x4   :  { %p99_p0 = scmp.ne.s32.totalorder %s198_s0, %s98_s18  ;;  %p102_p1 = scmp.lt.u32.totalorder %s98_s18, %s198_s0 }
   0x6   :  { %p104_p2 = pnand %p102_p1, %p99_p0 }
   0x8   :  { %107 = shalt.err (!%p104_p2)
}
   0x9   :  { %s108_s23 = scalar_lea.vmem %s17_s13, 256  ;;  %p113_p4 = scmp.lt.s32.totalorder %s17_s13, %s17_s13 }
   0xa   :  { %p109_p3 = scmp.ne.s32.totalorder %s17_s13, %s108_s23  ;;  %p114_p5 = scmp.lt.s32.totalorder %s108_s23, %s108_s23 }
   0xc   :  { %p115_p6 = por %p114_p5, %p113_p4 }
   0xe   :  { %p116_p7 = pnand %p115_p6, %p109_p3 }
  0x10   :  { %119 = shalt.err (!%p116_p7)
}
  0x11   :  { %19 = dma.hbm_to_vmem [thread:$0]  %s198_s0, 256, %s17_s13, [#allocation4]  }
  0x12   :  { %s120_s28 = scalar_lea.hbm %s199_s1, 256 }
  0x13   :  { %p121_p8 = scmp.ne.s32.totalorder %s199_s1, %s120_s28  ;;  %p124_p9 = scmp.lt.u32.totalorder %s120_s28, %s199_s1 }
  0x15   :  { %p126_p10 = pnand %p124_p9, %p121_p8 }
  0x17   :  { %129 = shalt.err (!%p126_p10)
}
  0x18   :  { %s130_s6 = scalar_lea.vmem %s27_s15, 256  ;;  %p135_p12 = scmp.lt.s32.totalorder %s27_s15, %s27_s15 }
  0x19   :  { %p131_p11 = scmp.ne.s32.totalorder %s27_s15, %s130_s6  ;;  %p136_p13 = scmp.lt.s32.totalorder %s130_s6, %s130_s6 }
  0x1b   :  { %p137_p0 = por %p136_p13, %p135_p12 }
  0x1d   :  { %p138_p1 = pnand %p137_p0, %p131_p11 }
  0x1f   :  { %141 = shalt.err (!%p138_p1)
}
  0x20   :  { %29 = dma.hbm_to_vmem [thread:$0]  %s199_s1, 256, %s27_s15, [#allocation6]  }
  0x21   :  { %142 = dma.done.wait [#allocation4], 256  }
  0x22   :  { %143 = vsyncadd [#allocation4], 4294967040 }
  0x23   :  { %144 = dma.done.wait [#allocation6], 256  }
  0x24   :  { %145 = vsyncadd [#allocation6], 4294967040  ;;  %v46_v0 = vld [vmem:[#allocation5] sm:$0xff]  ;;  %v47_v1 = vld [vmem:[#allocation5 + $0x8] sm:$0xff]  ;;  %vm80_vm0 = vcmask 7168  }
  0x25   :  { %v54_v2 = vadd.f32 1e-16, %v46_v0  ;;  %v55_v3 = vadd.f32 1e-16, %v47_v1  ;;  %v44_v4 = vld [vmem:[#allocation3] sm:$0xff]  ;;  %v45_v5 = vld [vmem:[#allocation3 + $0x8] sm:$0xff] }
  0x26   :  { %v52_v6 = vadd.f32 1e-16, %v44_v4  ;;  %v53_v7 = vadd.f32 1e-16, %v45_v5  ;;  %v50_v12 = vsub.f32 0.0, %v46_v0  ;;  %v51_v14 = vsub.f32 0.0, %v47_v1 }
  0x27   :  { %90 = vrcp.f32 %v54_v2  ;;  %v78_v21 = vld [vmem:[%s200_s2] sm:$0xff] }
  0x28   :  { %92 = vrcp.f32 %v55_v3 }
  0x31   :  { %v91_v8 = vpop.eup %90 }
  0x32   :  { %v93_v9 = vpop.eup %92  ;;  %v57_v10 = vmul.f32 %v91_v8, %v52_v6 }
  0x33   :  { %v59_v11 = vmul.f32 %v93_v9, %v53_v7 }
  0x34   :  { %94 = vlog2.f32 %v57_v10 }
  0x35   :  { %96 = vlog2.f32 %v59_v11 }
  0x3e   :  { %v95_v13 = vpop.eup %94 }
  0x3f   :  { %v97_v15 = vpop.eup %96  ;;  %v61_v16 = vmul.f32 0.6931472, %v95_v13 }
  0x40   :  { %v63_v17 = vmul.f32 0.6931472, %v97_v15 }
  0x41   :  { %v64_v18 = vmul.f32 %v61_v16, %v50_v12 }
  0x42   :  { %v65_v19 = vmul.f32 %v63_v17, %v51_v14 }
  0x44   :  { %v75_v20 = vadd.f32 %v65_v19, %v64_v18 }
  0x46   :  { %76 = vadd.xlane.f32.xlu0 %v75_v20 }
  0xd3   :  { %v77_v22 = vpop.xlane.xlu0 %76 }
  0xd4   :  { %v79_v23 = vmul.f32 %v78_v21, %v77_v22 }
  0xd6   :  { %81 = vst.msk [vmem:[%s201_s3] sm:$0xff] %vm80_vm0, %v79_v23 }
  0xd7   :  { %86 = vsyncpa [#allocation4], 1 }
  0xd8   :  { %87 = vsyncpa [#allocation6], 1 }

</bundles_post_ra>
